<compile_context>
chip_gen: v5e
topology: v5e:2x2
jax: 0.10.0
libtpu: 0.0.40
codegen_flags: <defaults>
</compile_context>

<pallas_src>
import jax
import jax.numpy as jnp
from jax import lax
from jax.experimental import pallas as pl
from jax.experimental.pallas import tpu as pltpu


def _round_up(x, m):
    return ((x + m - 1) // m) * m


def _cdiv(a, b):
    return (a + b - 1) // b


def _value_net_kernel(s_ref, a_ref, w1_ref, b1_ref, w2_ref, b2_ref,
                      w3_ref, b3_ref, o_ref):
    # s: (TB, ni)   a: (TB, na)      w1: (ni+na, H)   b1/b2: (1, H)
    # w2: (H, H)    w3: (1, H)       b3: (1, 1) scalar in SMEM
    # o: (1, TB)  -- batch on the lane axis (lane-dense stores)

    # Layer 1: in-VMEM lane concat (D fits in one 128-lane vreg row), then ONE
    # MXU matmul against the unsplit w1 (pushes scale with M, not K).
    x = jnp.concatenate([s_ref[...], a_ref[...]], axis=1)
    h1 = jnp.dot(x, w1_ref[...], preferred_element_type=jnp.float32) + b1_ref[...]
    h1 = jnp.maximum(h1, 0.0)

    # Layer 2: cast the LHS back to the weight dtype so the bf16 path really
    # runs a bf16 MXU matmul (f32 accumulation via preferred_element_type).
    h2 = jnp.dot(h1.astype(w2_ref.dtype), w2_ref[...],
                 preferred_element_type=jnp.float32) + b2_ref[...]
    h2 = jnp.maximum(h2, 0.0)

    # Layer 3 (N=1): contract on H with batch landing on the lane axis
    # -> (1, TB) result, unmasked full-width stores into the (1, tb) out block.
    out_row = lax.dot_general(w3_ref[...], h2, (((1,), (1,)), ((), ())),
                              preferred_element_type=jnp.float32)
    o_ref[...] = (out_row + b3_ref[0, 0]).astype(o_ref.dtype)


def value_network_forward(state, action, params, batch_size, *,
                          block_b=2048, compute_dtype=jnp.float32):
    """JAX wrapper reproducing ValueNetwork.forward with a batch-tiled Pallas kernel."""
    num_actions = params["num_actions"]
    num_inputs = params["w1"].shape[0] - num_actions
    H = params["w1"].shape[1]
    D = num_inputs + num_actions

    s = state.reshape((batch_size, num_inputs))
    a = action.reshape((batch_size, num_actions))

    w1 = params["w1"]
    w2 = params["w2"]
    w3_row = params["w3"].reshape((1, H)).astype(jnp.float32)
    b1, b2, b3 = params["b1"], params["b2"], params["b3"]

    if compute_dtype != jnp.float32:
        # bf16 operands for the two big matmuls; biases/ReLU/final layer stay f32.
        s = s.astype(compute_dtype)
        a = a.astype(compute_dtype)
        w1 = w1.astype(compute_dtype)
        w2 = w2.astype(compute_dtype)

    itemsize = jnp.dtype(compute_dtype).itemsize
    sublane = 8 * max(1, 4 // itemsize)          # 8 (f32), 16 (bf16), 32 (int8/fp8)
    block_b = max(sublane, (block_b // sublane) * sublane)

    # Tile: big enough to amortize ~0.35us/step grid overhead, small enough that
    # any batch >= 2*sublane yields >= 2 "parallel" steps (both TCs on v7x).
    tb = min(block_b, _round_up(max(1, _cdiv(batch_size, 2)), sublane))
    num_tiles = _cdiv(batch_size, tb)            # ragged last tile handled by Pallas
    grid = (num_tiles,)

    cost = pl.CostEstimate(
        flops=2 * batch_size * (D * H + H * H + H),
        transcendentals=0,
        bytes_accessed=(itemsize * (batch_size * D + D * H + H * H)
                        + 4 * (2 * H + 1 + num_tiles * tb)),
    )

    out = pl.pallas_call(
        _value_net_kernel,
        out_shape=jax.ShapeDtypeStruct((num_tiles, tb), jnp.float32),
        grid=grid,
        in_specs=[
            # Batch-tiled activations (double-buffered across grid steps).
            pl.BlockSpec((tb, num_inputs), lambda i: (i, 0)),
            pl.BlockSpec((tb, num_actions), lambda i: (i, 0)),
            # Weights/biases: constant block index -> DMA'd once, VMEM-resident.
            pl.BlockSpec((D, H), lambda i: (0, 0)),
            pl.BlockSpec((1, H), lambda i: (0, 0)),
            pl.BlockSpec((H, H), lambda i: (0, 0)),
            pl.BlockSpec((1, H), lambda i: (0, 0)),
            pl.BlockSpec((1, H), lambda i: (0, 0)),
            # b3 is a single scalar: keep it in SMEM (no padded VMEM tile).
            pl.BlockSpec(memory_space=pltpu.MemorySpace.SMEM),
        ],
        # Lane-dense output: last block dim is tb (full array extent).
        out_specs=pl.BlockSpec((1, tb), lambda i: (i, 0)),
        compiler_params=pltpu.CompilerParams(
            dimension_semantics=("parallel",),   # shards batch tiles across TCs on v7x
        ),
        cost_estimate=cost,
    )(s, a, w1, b1, w2, b2, w3_row, b3)

    # (num_tiles, tb) with batch on the lane axis -> (B, 1); tail rows sliced off.
    return out.reshape((num_tiles * tb, 1))[:batch_size]


def init_params(key, num_inputs, num_actions, hidden_size, init_w=0.1):
    """Deterministic init mirroring nn.Linear defaults + uniform init on linear3.
    Weights are stored already transposed to (in, out) for the kernel."""
    k1, k2, k3, k4, k5, k6 = jax.random.split(key, 6)
    d_in = num_inputs + num_actions

    def linear_init(kw, kb, fan_in, fan_out):
        bound = 1.0 / jnp.sqrt(float(fan_in))
        w = jax.random.uniform(kw, (fan_in, fan_out), jnp.float32, -bound, bound)
        b = jax.random.uniform(kb, (1, fan_out), jnp.float32, -bound, bound)
        return w, b

    w1, b1 = linear_init(k1, k2, d_in, hidden_size)
    w2, b2 = linear_init(k3, k4, hidden_size, hidden_size)
    # linear3: uniform_(-init_w, init_w) on both weight and bias
    w3 = jax.random.uniform(k5, (hidden_size, 1), jnp.float32, -init_w, init_w)
    b3 = jax.random.uniform(k6, (1, 1), jnp.float32, -init_w, init_w)

    return {
        "w1": w1, "b1": b1,
        "w2": w2, "b2": b2,
        "w3": w3, "b3": b3,
        "num_actions": num_actions,
    }


def reference_forward(state, action, params, batch_size):
    num_actions = params["num_actions"]
    num_inputs = params["w1"].shape[0] - num_actions
    s = state.reshape((batch_size, num_inputs))
    a = action.reshape((batch_size, num_actions))
    x = jnp.concatenate([s, a], axis=1)
    x = jnp.maximum(x @ params["w1"] + params["b1"], 0.0)
    x = jnp.maximum(x @ params["w2"] + params["b2"], 0.0)
    return x @ params["w3"] + params["b3"]


if __name__ == "__main__":
    num_inputs = 16
    num_actions = 4
    hidden_size = 32

    key = jax.random.PRNGKey(0)
    kp, ks, ka = jax.random.split(key, 3)
    params = init_params(kp, num_inputs, num_actions, hidden_size)

    # Test 1: single-tile grid (B <= sublane).
    B1 = 8
    state = jax.random.normal(ks, (B1, num_inputs), jnp.float32)
    action = jax.random.normal(ka, (B1, num_actions), jnp.float32)
    out = jax.block_until_ready(value_network_forward(state, action, params, B1))
    ref = reference_forward(state, action, params, B1)
    assert out.shape == (B1, 1)
    assert jnp.allclose(out, ref, atol=1e-5, rtol=1e-5)

    # Test 2: two "parallel" grid steps + ragged last tile (B=10 -> tb=8, grid=(2,)).
    B2 = 10
    ks2, ka2 = jax.random.split(jax.random.PRNGKey(1))
    state2 = jax.random.normal(ks2, (B2, num_inputs), jnp.float32)
    action2 = jax.random.normal(ka2, (B2, num_actions), jnp.float32)
    out2 = jax.block_until_ready(value_network_forward(state2, action2, params, B2))
    ref2 = reference_forward(state2, action2, params, B2)
    assert out2.shape == (B2, 1)
    assert jnp.allclose(out2, ref2, atol=1e-5, rtol=1e-5)

    # Test 3: larger batch -> lane-dense (tb >= 128) output blocks, 2 tiles, ragged tail.
    B3 = 300
    ks3, ka3 = jax.random.split(jax.random.PRNGKey(2))
    state3 = jax.random.normal(ks3, (B3, num_inputs), jnp.float32)
    action3 = jax.random.normal(ka3, (B3, num_actions), jnp.float32)
    out3 = jax.block_until_ready(value_network_forward(state3, action3, params, B3))
    ref3 = reference_forward(state3, action3, params, B3)
    assert out3.shape == (B3, 1)
    assert jnp.allclose(out3, ref3, atol=1e-5, rtol=1e-5)

    # Test 4: bf16 compute path (bf16 MXU matmuls, f32 accumulation / bias / ReLU).
    # Looser tolerance vs. the f32 reference, as expected for bf16 operands.
    B4 = 64
    ks4, ka4 = jax.random.split(jax.random.PRNGKey(3))
    state4 = jax.random.normal(ks4, (B4, num_inputs), jnp.float32)
    action4 = jax.random.normal(ka4, (B4, num_actions), jnp.float32)
    out4 = jax.block_until_ready(
        value_network_forward(state4, action4, params, B4, compute_dtype=jnp.bfloat16))
    ref4 = reference_forward(state4, action4, params, B4)
    assert out4.shape == (B4, 1)
    assert jnp.allclose(out4, ref4, atol=8e-2, rtol=5e-2)

    print("KERNEL_OK")
</pallas_src>

<mosaic_0001>
module attributes {stable_mosaic.version = 11 : i64} {
  func.func @_value_net_kernel(%arg0: i32, %arg1: memref<8x16xf32, #tpu.memory_space<vmem>>, %arg2: memref<8x4xf32, #tpu.memory_space<vmem>>, %arg3: memref<20x32xf32, #tpu.memory_space<vmem>>, %arg4: memref<1x32xf32, #tpu.memory_space<vmem>>, %arg5: memref<32x32xf32, #tpu.memory_space<vmem>>, %arg6: memref<1x32xf32, #tpu.memory_space<vmem>>, %arg7: memref<1x32xf32, #tpu.memory_space<vmem>>, %arg8: memref<1x1xf32, #tpu.memory_space<smem>>, %arg9: memref<1x8xf32, #tpu.memory_space<vmem>>) attributes {dimension_semantics = [#tpu.dimension_semantics<parallel>], iteration_bounds = array<i64: 1>, scalar_prefetch = 0 : i64, scratch_operands = 0 : i64, tpu.core_type = #tpu.core_type<tc>, window_params = [{transform_indices = @transform_0, window_bounds = array<i64: 8, 16>}, {transform_indices = @transform_1, window_bounds = array<i64: 8, 4>}, {pipeline_mode = #tpu.pipeline_mode<synchronous>, transform_indices = @transform_2, window_bounds = array<i64: 20, 32>}, {pipeline_mode = #tpu.pipeline_mode<synchronous>, transform_indices = @transform_3, window_bounds = array<i64: 1, 32>}, {pipeline_mode = #tpu.pipeline_mode<synchronous>, transform_indices = @transform_4, window_bounds = array<i64: 32, 32>}, {pipeline_mode = #tpu.pipeline_mode<synchronous>, transform_indices = @transform_5, window_bounds = array<i64: 1, 32>}, {pipeline_mode = #tpu.pipeline_mode<synchronous>, transform_indices = @transform_6, window_bounds = array<i64: 1, 32>}, {transform_indices = @transform_7, window_bounds = array<i64: 1, 1>}, {transform_indices = @transform_8, window_bounds = array<i64: 1, 8>}]} {
    %c0 = arith.constant 0 : index
    %c0_0 = arith.constant 0 : index
    %0 = vector.load %arg1[%c0, %c0_0] : memref<8x16xf32, #tpu.memory_space<vmem>>, vector<8x16xf32>
    %c0_1 = arith.constant 0 : index
    %c0_2 = arith.constant 0 : index
    %1 = vector.load %arg2[%c0_1, %c0_2] : memref<8x4xf32, #tpu.memory_space<vmem>>, vector<8x4xf32>
    %2 = tpu.concatenate %0, %1 in 1 : vector<8x16xf32>, vector<8x4xf32> -> vector<8x20xf32>
    %c0_3 = arith.constant 0 : index
    %c0_4 = arith.constant 0 : index
    %3 = vector.load %arg3[%c0_3, %c0_4] : memref<20x32xf32, #tpu.memory_space<vmem>>, vector<20x32xf32>
    %cst = arith.constant dense<0.000000e+00> : vector<8x32xf32>
    %4 = tpu.matmul %2, %3, %cst {dimension_numbers = #tpu.dot_dimension_numbers<[1], [0], [0], [1], [0, 0, 1, 1], [], []>} : vector<8x20xf32>, vector<20x32xf32>, vector<8x32xf32> -> vector<8x32xf32>
    %c0_5 = arith.constant 0 : index
    %c0_6 = arith.constant 0 : index
    %5 = vector.load %arg4[%c0_5, %c0_6] : memref<1x32xf32, #tpu.memory_space<vmem>>, vector<1x32xf32>
    %6 = vector.broadcast %5 : vector<1x32xf32> to vector<8x32xf32>
    %7 = arith.addf %4, %6 : vector<8x32xf32>
    %cst_7 = arith.constant 0.000000e+00 : f32
    %8 = vector.broadcast %cst_7 : f32 to vector<8x32xf32>
    %9 = arith.maximumf %7, %8 : vector<8x32xf32>
    %c0_8 = arith.constant 0 : index
    %c0_9 = arith.constant 0 : index
    %10 = vector.load %arg5[%c0_8, %c0_9] : memref<32x32xf32, #tpu.memory_space<vmem>>, vector<32x32xf32>
    %cst_10 = arith.constant dense<0.000000e+00> : vector<8x32xf32>
    %11 = tpu.matmul %9, %10, %cst_10 {dimension_numbers = #tpu.dot_dimension_numbers<[1], [0], [0], [1], [0, 0, 1, 1], [], []>} : vector<8x32xf32>, vector<32x32xf32>, vector<8x32xf32> -> vector<8x32xf32>
    %c0_11 = arith.constant 0 : index
    %c0_12 = arith.constant 0 : index
    %12 = vector.load %arg6[%c0_11, %c0_12] : memref<1x32xf32, #tpu.memory_space<vmem>>, vector<1x32xf32>
    %13 = vector.broadcast %12 : vector<1x32xf32> to vector<8x32xf32>
    %14 = arith.addf %11, %13 : vector<8x32xf32>
    %cst_13 = arith.constant 0.000000e+00 : f32
    %15 = vector.broadcast %cst_13 : f32 to vector<8x32xf32>
    %16 = arith.maximumf %14, %15 : vector<8x32xf32>
    %c0_14 = arith.constant 0 : index
    %c0_15 = arith.constant 0 : index
    %17 = vector.load %arg7[%c0_14, %c0_15] : memref<1x32xf32, #tpu.memory_space<vmem>>, vector<1x32xf32>
    %cst_16 = arith.constant dense<0.000000e+00> : vector<1x8xf32>
    %18 = tpu.matmul %17, %16, %cst_16 {dimension_numbers = #tpu.dot_dimension_numbers<[1], [1], [0], [0], [0, 0, 1, 0], [], []>} : vector<1x32xf32>, vector<8x32xf32>, vector<1x8xf32> -> vector<1x8xf32>
    %c0_17 = arith.constant 0 : index
    %c0_18 = arith.constant 0 : index
    %19 = memref.load %arg8[%c0_17, %c0_18] : memref<1x1xf32, #tpu.memory_space<smem>>
    %20 = vector.broadcast %19 : f32 to vector<1x8xf32>
    %21 = arith.addf %18, %20 : vector<1x8xf32>
    %c0_19 = arith.constant 0 : index
    %c0_20 = arith.constant 0 : index
    %22 = vector.load %arg9[%c0_19, %c0_20] : memref<1x8xf32, #tpu.memory_space<vmem>>, vector<1x8xf32>
    tpu.vector_store %arg9[%c0_19, %c0_20], %21 {strides = array<i32>} : memref<1x8xf32, #tpu.memory_space<vmem>>, vector<1x8xf32>,
    return
  }
  func.func @transform_0(%arg0: i32) -> (i32, i32) {
    %c0_i32 = arith.constant 0 : i32
    %c0_i32_0 = arith.constant 0 : i32
    return %arg0, %c0_i32 : i32, i32
  }
  func.func @transform_1(%arg0: i32) -> (i32, i32) {
    %c0_i32 = arith.constant 0 : i32
    %c0_i32_0 = arith.constant 0 : i32
    return %arg0, %c0_i32 : i32, i32
  }
  func.func @transform_2(%arg0: i32) -> (i32, i32) {
    %c0_i32 = arith.constant 0 : i32
    %c0_i32_0 = arith.constant 0 : i32
    %c0_i32_1 = arith.constant 0 : i32
    return %c0_i32, %c0_i32_0 : i32, i32
  }
  func.func @transform_3(%arg0: i32) -> (i32, i32) {
    %c0_i32 = arith.constant 0 : i32
    %c0_i32_0 = arith.constant 0 : i32
    %c0_i32_1 = arith.constant 0 : i32
    return %c0_i32, %c0_i32_0 : i32, i32
  }
  func.func @transform_4(%arg0: i32) -> (i32, i32) {
    %c0_i32 = arith.constant 0 : i32
    %c0_i32_0 = arith.constant 0 : i32
    %c0_i32_1 = arith.constant 0 : i32
    return %c0_i32, %c0_i32_0 : i32, i32
  }
  func.func @transform_5(%arg0: i32) -> (i32, i32) {
    %c0_i32 = arith.constant 0 : i32
    %c0_i32_0 = arith.constant 0 : i32
    %c0_i32_1 = arith.constant 0 : i32
    return %c0_i32, %c0_i32_0 : i32, i32
  }
  func.func @transform_6(%arg0: i32) -> (i32, i32) {
    %c0_i32 = arith.constant 0 : i32
    %c0_i32_0 = arith.constant 0 : i32
    %c0_i32_1 = arith.constant 0 : i32
    return %c0_i32, %c0_i32_0 : i32, i32
  }
  func.func @transform_7(%arg0: i32) -> (i32, i32) {
    %c0_i32 = arith.constant 0 : i32
    %c0_i32_0 = arith.constant 0 : i32
    %c0_i32_1 = arith.constant 0 : i32
    return %c0_i32, %c0_i32_0 : i32, i32
  }
  func.func @transform_8(%arg0: i32) -> (i32, i32) {
    %c0_i32 = arith.constant 0 : i32
    %c0_i32_0 = arith.constant 0 : i32
    return %arg0, %c0_i32 : i32, i32
  }
}

</mosaic_0001>

<bundles_post_ra>
// kernel: tpu_custom_call.1
= control target key start
LH: loop header
LB: loop body
LE: loop exit
PB: predicated region body
PF: predicated region fallthrough
CT: control target
= control target key end

     0   :  { %14 = vsyncpa [#allocation4], 0  ;;  %s358_s0 = inlined_call_operand.vmem [shape: f32[8,16], index: 0, kind: input, shape index: {}]   ;;  %s359_s1 = inlined_call_operand.vmem [shape: f32[8,4], index: 1, kind: input, shape index: {}]   ;;  %s360_s2 = inlined_call_operand.hbm [shape: f32[20,32], index: 2, kind: input, shape index: {}]   ;;  %s361_s3 = inlined_call_operand.vmem [shape: f32[1,32], index: 3, kind: input, shape index: {}]   ;;  %s362_s4 = inlined_call_operand.hbm [shape: f32[32,32], index: 4, kind: input, shape index: {}]   ;;  %s363_s5 = inlined_call_operand.vmem [shape: f32[1,32], index: 5, kind: input, shape index: {}]   ;;  %s364_s6 = inlined_call_operand.vmem [shape: f32[1,32], index: 6, kind: input, shape index: {}]   ;;  %s365_s7 = inlined_call_operand.<no memory space> [shape: f32[1,1], index: 7, kind: input, shape index: {}]   ;;  %s366_s8 = inlined_call_operand.hbm [shape: f32[1,8], index: 8, kind: output, shape index: {}]  }
   0x1   :  { %15 = vsyncpa [#allocation7], 0 }
   0x2   :  { %16 = vsyncpa [#allocation5], 0  ;;  %s25_s29 = sshll.u32 %s360_s2, 4  ;;  %s280_s30 = smov [#allocation3]   ;;  %s26_s29 = int_to_ptr.hbm [resolvable:$true] %s25_s29 }
   0x3   :  { %s27_s9 = sshll.u32 %s280_s30, 4  ;;  %s40_s12 = sshll.u32 %s362_s4, 4  ;;  %s28_s9 = int_to_ptr.vmem [resolvable:$true] %s27_s9  ;;  %s41_s12 = int_to_ptr.hbm [resolvable:$true] %s40_s12 }
   0x4   :  { %s281_s13 = smov 128   ;;  %s282_s14 = smov 8  }
   0x5   :  { %33 = dma.hbm_to_vmem [thread:$0]  %s26_s29, 384, %s28_s9, [#allocation4], %s281_s13, %s281_s13, %s282_s14  }
   0x6   :  { %s283_s15 = smov [#allocation6]  }
   0x7   :  { %s42_s16 = sshll.u32 %s283_s15, 4  ;;  %s43_s16 = int_to_ptr.vmem [resolvable:$true] %s42_s16 }
   0x8   :  { %48 = dma.hbm_to_vmem [thread:$0]  %s41_s12, 512, %s43_s16, [#allocation7], %s281_s13, %s281_s13, %s282_s14  }
   0x9   :  { %274 = dma.done.wait [#allocation4], 384  }
   0xa   :  { %275 = vsyncadd [#allocation4], 4294966912 }
   0xb   :  { %276 = dma.done.wait [#allocation7], 512  }
   0xc   :  { %277 = vsyncadd [#allocation7], 4294966784  ;;  %vm82_vm0 = vcmask 1043456   ;;  %v64_v0 = vld [vmem:[%s359_s1] sm:$0xff]  ;;  %v73_v1 = vld [vmem:[#allocation3 + $0x10] sm:$0xf]  ;;  %v142_v20 = vstv %s365_s7 }
   0xd   :  { %v72_v2 = vld [vmem:[#allocation3 + $0x8] sm:$0xff]  ;;  %s284_s4 = smov 16   ;;  %189 = vmatpush.msk.msra.mxu0 %vm82_vm0, %v73_v1  ;;  %v71_v3 = vld [vmem:[#allocation3] sm:$0xff]  ;;  %v110_v4 = vld [vmem:[#allocation6 + $0x18] sm:$0xff]  ;;  %vm69_vm1 = vcmask 130048   ;;  %vm78_vm2 = vcmask 162816  }
   0xe   :  { %66 = vrot.lane.b32.xlu0 %v64_v0, %s284_s4  ;;  %131 = vmatpush.msra.mxu1 %v110_v4  ;;  %v63_v5 = vld [vmem:[%s358_s0] sm:$0xff]  ;;  %v109_v8 = vld [vmem:[#allocation6 + $0x10] sm:$0xff]  ;;  %v107_v10 = vld [vmem:[#allocation6] sm:$0xff]  ;;  %vm115_vm3 = vcmask 261120   ;;  %s285_s25 = smov [#allocation8]   ;;  %s178_s29 = sshll.u32 %s366_s8, 4  ;;  %s179_s29 = int_to_ptr.hbm [resolvable:$true] %s178_s29 }
   0xf   :  { %100 = vmatpush.msra.mxu0 %v72_v2  ;;  %v108_v9 = vld [vmem:[#allocation6 + $0x8] sm:$0xff]  ;;  %s176_s26 = sshll.u32 %s285_s25, 4  ;;  %vm169_vm4 = vcmask 57344   ;;  %s177_s26 = int_to_ptr.vmem [resolvable:$true] %s176_s26 }
  0x10   :  { %132 = vmatpush.msra.mxu1 %v109_v8  ;;  %v200_v11 = vld [vmem:[%s361_s3] ss:$0 sm:$0xff] }
  0x11   :  { %101 = vmatpush.msra.mxu0 %v71_v3  ;;  %v201_v15 = vld [vmem:[%s363_s5] ss:$0 sm:$0xff] }
  0x12   :  { %133 = vmatpush.msra.mxu1 %v108_v9  ;;  %v140_v19 = vld [vmem:[%s364_s6] sm:$0x1] }
  0x14   :  { %134 = vmatpush.msra.mxu1 %v107_v10 }
  0x80   :  { %v67_v6 = vpop.permute.xlu0 %66 }
  0x81   :  { %v70_v7 = vsel %vm69_vm1, %v63_v5, %v67_v6 }
  0x82   :  { %190 = vmatmul.msk.f32.vlgmr.msra.gmra.mxu0 %vm78_vm2, %v70_v7 }
  0xff   :  { %v103_v12 = vpop.f32.mrf.mxu0 }
 0x100   :  { %v104_v13 = vadd.f32 %v200_v11, %v103_v12 }
 0x102   :  { %v106_v14 = vmax.f32 %v104_v13, 0.0 }
 0x104   :  { %191 = vmatmul.msk.f32.vlgmr.msra.gmra.mxu1 %vm115_vm3, %v106_v14 }
 0x181   :  { %v136_v16 = vpop.f32.mrf.mxu1 }
 0x182   :  { %v137_v17 = vadd.f32 %v201_v15, %v136_v16 }
 0x184   :  { %v139_v18 = vmax.f32 %v137_v17, 0.0 }
 0x186   :  { %192 = vmatpush.xpose.msk.msra.mxu2 %vm115_vm3, %v139_v18 }
 0x189   :  { %193 = vmatmul.msk.f32.vlgmr.msra.gmra.mxu2 %vm115_vm3, %v140_v19 }
 0x20c   :  { %v166_v21 = vpop.f32.mrf.mxu2 }
 0x20d   :  { %v167_v22 = vadd.f32 %v166_v21, %v142_v20 }
 0x20f   :  { %170 = vst.msk [vmem:[#allocation8] sm:$0x1] %vm169_vm4, %v167_v22 }
 0x210   :  { %181 = dma.vmem_to_hbm [thread:$0]  %s177_s26, 16, %s179_s29, [#allocation5]  }
 0x211   :  { %278 = dma.done.wait [#allocation5], 16  }
 0x212   :  { %279 = vsyncadd [#allocation5], 4294967280 }
 0x213   :  { %186 = vsyncpa [#allocation4], 1 }
 0x214   :  { %187 = vsyncpa [#allocation7], 1 }
 0x215   :  { %188 = vsyncpa [#allocation5], 1 }

</bundles_post_ra>
